<compile_context>
chip_gen: v6e
topology: v6e:2x2x1
jax: 0.10.0
libtpu: 0.0.40
codegen_flags: <defaults>
</compile_context>

<pallas_src>
import functools

import jax
import jax.numpy as jnp
import numpy as np
from jax.experimental import pallas as pl
from jax.experimental.pallas import tpu as pltpu


# ----------------------------------------------------------------------------
# Small helpers (trace-time Python, all static)
# ----------------------------------------------------------------------------
def _cdiv(a, b):
    return -(-a // b)


def _target_block_bytes():
    # Per-block byte budget.  Live VMEM ~= 4 x this (double-buffered in + out):
    #   v5e  : 2 MiB block ->  8 MiB live  (16 MiB scoped default)
    #   v6e  : 4 MiB block -> 16 MiB live  (32 MiB scoped default)
    #   v7x  : 4 MiB block -> 16 MiB live  (32 MiB scoped default, 64 MiB phys)
    try:
        kind = jax.devices()[0].device_kind.lower()
    except Exception:
        kind = ""
    if "v4" in kind or "v5" in kind or "lite" in kind:
        return 2 * 1024 * 1024
    return 4 * 1024 * 1024


def _pick_lane_tile(lout):
    """Lane tile (multiple of 128, <= lout): prefer an exact divisor of lout,
    else one whose tail block still has >= 128 dense lanes, else 128."""
    cands = [c for c in (1024, 896, 768, 640, 512, 384, 256, 128) if c <= lout]
    for c in cands:
        if lout % c == 0:
            return c
    for c in cands:
        if lout % c >= 128:
            return c
    return 128


def _pick_row_tile(n_rows, row_bytes, target_bytes):
    """Rows per block so the block is ~target_bytes; multiple of 8 (or the full
    row extent when it is < 8, which is always a legal block dim)."""
    if n_rows < 8:
        return n_rows
    tr = max(8, (target_bytes // max(row_bytes, 1)) // 8 * 8)
    return min(tr, _cdiv(n_rows, 8) * 8)


def _adjust_for_megacore(R, lout, tr, tl):
    """(a) guarantee >= 2 grid steps so v7x's 2nd TensorCore gets work;
    (b) prefer an even step count so a 2-core split is balanced (shrink the
        row tile by at most 64 rows chasing evenness)."""
    if _cdiv(R, tr) * _cdiv(lout, tl) == 1:
        if R >= 16:
            tr = max(8, (R // 2) // 8 * 8)
        elif lout >= 2 * 128 and tl >= 256:
            tl = max(128, (tl // 2) // 128 * 128)
    n_row, n_lane = _cdiv(R, tr), _cdiv(lout, tl)
    if n_row > 1 and (n_row * n_lane) % 2 == 1:
        for cand in range(tr - 8, max(tr - 64, 8) - 1, -8):
            if _cdiv(R, cand) % 2 == 0:
                tr = cand
                break
    return tr, tl


def _pick_group(R, lout):
    """Smallest group size g with g*lout >= 128 that divides R (so packed
    output rows are exactly R//g); None -> fall back to masked narrow path."""
    g0 = _cdiv(128, lout)
    for g in range(g0, min(R, 4 * g0) + 1):
        if R % g == 0:
            return g
    return None


# ----------------------------------------------------------------------------
# Kernels
# ----------------------------------------------------------------------------
def _copy_kernel(x_ref, o_ref):
    # Lane-dense path: identical (rows, lanes) blocks -> full-width vld/vst.
    o_ref[...] = x_ref[...]


def _chomp_narrow_kernel(x_ref, o_ref, *, lout):
    # Fallback narrow path (lout < 128, no usable row grouping): keep the first
    # `lout` lanes of each row (masked store, unavoidable here).
    o_ref[...] = x_ref[:, :lout]


def _chomp_grouped_kernel(x_ref, o_ref, *, g, lout):
    # Packed narrow path: g full input rows per output row; concatenate their
    # kept prefixes into one (rows, g*lout) slab -> a single dense >=128-lane
    # store instead of g masked stores.
    x = x_ref[...]                                   # (tr, g, L)
    parts = [x[:, i, :lout] for i in range(g)]       # g x (tr, lout)
    o_ref[...] = jnp.concatenate(parts, axis=-1)     # (tr, g*lout)


# ----------------------------------------------------------------------------
# Wrapper
# ----------------------------------------------------------------------------
def chomp1d(x, chomp_size):
    """Pallas implementation of Chomp1d: returns x[:, :, :-chomp_size].

    x: (B, C, L) array (any dtype). chomp_size: python int, 0 < chomp_size < L.
    """
    B, C, L = x.shape
    if not (0 < chomp_size < L):
        raise ValueError(f"chomp_size must be in (0, L); got {chomp_size}, L={L}")
    lout = L - chomp_size

    # Collapse (B, C) into one fat row axis -> 2-D slabs. Metadata-only reshape.
    R = B * C
    x2 = x.reshape(R, L)
    itemsize = np.dtype(x.dtype).itemsize
    target = _target_block_bytes()

    if lout >= 128:
        # ---- Lane-dense path: only kept columns are DMA'd; dense stores. ----
        tl = _pick_lane_tile(lout)
        tr = _pick_row_tile(R, tl * itemsize, target)
        tr, tl = _adjust_for_megacore(R, lout, tr, tl)
        grid = (_cdiv(R, tr), _cdiv(lout, tl))
        in_specs = [pl.BlockSpec((tr, tl), lambda r, c: (r, c))]
        out_specs = pl.BlockSpec((tr, tl), lambda r, c: (r, c))
        out_shape = jax.ShapeDtypeStruct((R, lout), x.dtype)
        kernel = _copy_kernel
        operand = x2
        bytes_accessed = 2 * R * lout * itemsize
    else:
        g = _pick_group(R, lout)
        if g is not None:
            # ---- Packed narrow path: dense >=128-lane output stores. ----
            Rg = R // g
            operand = x2.reshape(Rg, g, L)
            tr = _pick_row_tile(Rg, g * L * itemsize, target)
            if _cdiv(Rg, tr) == 1 and Rg >= 16:   # keep >= 2 steps for megacore
                tr = max(8, (Rg // 2) // 8 * 8)
            grid = (_cdiv(Rg, tr),)
            in_specs = [pl.BlockSpec((tr, g, L), lambda r: (r, 0, 0))]
            out_specs = pl.BlockSpec((tr, g * lout), lambda r: (r, 0))
            out_shape = jax.ShapeDtypeStruct((Rg, g * lout), x.dtype)
            kernel = functools.partial(_chomp_grouped_kernel, g=g, lout=lout)
        else:
            # ---- Fallback narrow path (masked stores). ----
            operand = x2
            tr = _pick_row_tile(R, L * itemsize, target)
            if _cdiv(R, tr) == 1 and R >= 16:
                tr = max(8, (R // 2) // 8 * 8)
            grid = (_cdiv(R, tr),)
            in_specs = [pl.BlockSpec((tr, L), lambda r: (r, 0))]
            out_specs = pl.BlockSpec((tr, lout), lambda r: (r, 0))
            out_shape = jax.ShapeDtypeStruct((R, lout), x.dtype)
            kernel = functools.partial(_chomp_narrow_kernel, lout=lout)
        # Narrow paths must fetch the full L per row (lout < 128 cannot be a
        # lane-block width); chomped columns are read but never written.
        bytes_accessed = (R * L + R * lout) * itemsize

    y = pl.pallas_call(
        kernel,
        out_shape=out_shape,
        grid_spec=pltpu.PrefetchScalarGridSpec(
            num_scalar_prefetch=0,
            grid=grid,
            in_specs=in_specs,
            out_specs=out_specs,
        ),
        compiler_params=pltpu.CompilerParams(
            dimension_semantics=("parallel",) * len(grid)
        ),
        cost_estimate=pl.CostEstimate(
            flops=0, transcendentals=0, bytes_accessed=int(bytes_accessed)
        ),
    )(operand)

    return y.reshape(B, C, lout)


# ----------------------------------------------------------------------------
# Self-test
# ----------------------------------------------------------------------------
if __name__ == "__main__":
    key = jax.random.PRNGKey(0)
    k1, k2, k3 = jax.random.split(key, 3)

    # 1) Small shape from the module's NCL usage -> fallback narrow path.
    B, C, L, chomp = 2, 4, 16, 2
    x = jax.random.normal(k1, (B, C, L), jnp.float32)
    y = jax.block_until_ready(chomp1d(x, chomp))
    np.testing.assert_array_equal(np.asarray(y), np.asarray(x)[:, :, :-chomp])
    assert y.shape == (B, C, L - chomp)

    # 2) Lane-dense tiled path (still small).
    x2 = jax.random.normal(k2, (2, 8, 256), jnp.float32)
    y2 = jax.block_until_ready(chomp1d(x2, 3))
    np.testing.assert_array_equal(np.asarray(y2), np.asarray(x2)[:, :, :-3])

    # 3) Packed narrow path (lout=32 < 128, g=4 rows per dense output slab).
    x3 = jax.random.normal(k3, (2, 8, 40), jnp.float32)
    y3 = jax.block_until_ready(chomp1d(x3, 8))
    np.testing.assert_array_equal(np.asarray(y3), np.asarray(x3)[:, :, :-8])

    print("KERNEL_OK")
</pallas_src>

<mosaic_0001>
module attributes {stable_mosaic.version = 11 : i64} {
  func.func @_chomp_narrow_kernel(%arg0: i32, %arg1: memref<8x16xf32, #tpu.memory_space<vmem>>, %arg2: memref<8x14xf32, #tpu.memory_space<vmem>>) attributes {dimension_semantics = [#tpu.dimension_semantics<parallel>], iteration_bounds = array<i64: 1>, scalar_prefetch = 0 : i64, scratch_operands = 0 : i64, tpu.core_type = #tpu.core_type<tc>, window_params = [{transform_indices = @transform_0, window_bounds = array<i64: 8, 16>}, {transform_indices = @transform_1, window_bounds = array<i64: 8, 14>}]} {
    %c0 = arith.constant 0 : index
    %c0_0 = arith.constant 0 : index
    %0 = vector.load %arg1[%c0, %c0_0] : memref<8x16xf32, #tpu.memory_space<vmem>>, vector<8x14xf32>
    %c0_1 = arith.constant 0 : index
    %c0_2 = arith.constant 0 : index
    %1 = vector.load %arg2[%c0_1, %c0_2] : memref<8x14xf32, #tpu.memory_space<vmem>>, vector<8x14xf32>
    tpu.vector_store %arg2[%c0_1, %c0_2], %0 {strides = array<i32>} : memref<8x14xf32, #tpu.memory_space<vmem>>, vector<8x14xf32>,
    return
  }
  func.func @transform_0(%arg0: i32) -> (i32, i32) {
    %c0_i32 = arith.constant 0 : i32
    %c0_i32_0 = arith.constant 0 : i32
    return %arg0, %c0_i32 : i32, i32
  }
  func.func @transform_1(%arg0: i32) -> (i32, i32) {
    %c0_i32 = arith.constant 0 : i32
    %c0_i32_0 = arith.constant 0 : i32
    return %arg0, %c0_i32 : i32, i32
  }
}

</mosaic_0001>

<bundles_post_ra>
// kernel: tpu_custom_call.1
= control target key start
LH: loop header
LB: loop body
LE: loop exit
PB: predicated region body
PF: predicated region fallthrough
CT: control target
= control target key end

     0   :  { %6 = vsyncpa [#allocation3], 0  ;;  %s103_s0 = inlined_call_operand.hbm [shape: f32[8,16], index: 0, kind: input, shape index: {}]   ;;  %s104_s1 = inlined_call_operand.hbm [shape: f32[8,14], index: 1, kind: output, shape index: {}]  }
   0x1   :  { %7 = vsyncpa [#allocation4], 0  ;;  %s85_s6 = smov [#allocation2]  }
   0x2   :  { %s14_s7 = sshll.u32 %s85_s6, 4  ;;  %s15_s7 = int_to_ptr.vmem [resolvable:$true] %s14_s7 }
   0x3   :  { %s49_s8 = scalar_lea.vmem %s15_s7, 128  ;;  %p54_p1 = scmp.lt.s32.totalorder %s15_s7, %s15_s7 }
   0x4   :  { %p50_p0 = scmp.ne.s32.totalorder %s15_s7, %s49_s8  ;;  %p55_p2 = scmp.lt.s32.totalorder %s49_s8, %s49_s8 }
   0x6   :  { %p56_p3 = por %p55_p2, %p54_p1 }
   0x8   :  { %p57_p4 = pnand %p56_p3, %p50_p0 }
   0xa   :  { %60 = shalt.err (!%p57_p4)
}
   0xb   :  { %17 = dma.hbm_to_vmem [thread:$0]  %s103_s0, 128, %s15_s7, [#allocation3]  }
   0xc   :  { %81 = dma.done.wait [#allocation3], 128  }
   0xd   :  { %82 = vsyncadd [#allocation3], 4294967168  ;;  %s86_s11 = smov [#allocation5]   ;;  %vm22_vm0 = vcmask 113664   ;;  %v21_v0 = vld [vmem:[#allocation2] sm:$0xff] }
   0xe   :  { %s30_s12 = sshll.u32 %s86_s11, 4  ;;  %23 = vst.msk [vmem:[#allocation5] sm:$0xff] %vm22_vm0, %v21_v0  ;;  %s31_s12 = int_to_ptr.vmem [resolvable:$true] %s30_s12 }
   0xf   :  { %s61_s13 = scalar_lea.vmem %s31_s12, 128  ;;  %p66_p6 = scmp.lt.s32.totalorder %s31_s12, %s31_s12 }
  0x10   :  { %p62_p5 = scmp.ne.s32.totalorder %s31_s12, %s61_s13  ;;  %p67_p7 = scmp.lt.s32.totalorder %s61_s13, %s61_s13 }
  0x12   :  { %p68_p8 = por %p67_p7, %p66_p6 }
  0x14   :  { %p69_p9 = pnand %p68_p8, %p62_p5 }
  0x16   :  { %72 = shalt.err (!%p69_p9)
}
  0x17   :  { %33 = dma.vmem_to_hbm [thread:$0]  %s31_s12, 128, %s104_s1, [#allocation4]  }
  0x18   :  { %83 = dma.done.wait [#allocation4], 128  }
  0x19   :  { %84 = vsyncadd [#allocation4], 4294967168 }
  0x1a   :  { %37 = vsyncpa [#allocation3], 1 }
  0x1b   :  { %38 = vsyncpa [#allocation4], 1 }

</bundles_post_ra>
